<compile_context>
chip_gen: v5e
topology: v5e:2x2
jax: 0.10.0
libtpu: 0.0.40
codegen_flags: <defaults>
</compile_context>

<pallas_src>
import functools
import math

import jax
import jax.numpy as jnp
from jax.experimental import pallas as pl
from jax.experimental.pallas import tpu as pltpu

_MiB = 1024 * 1024


def _round_up(x, m):
    return ((x + m - 1) // m) * m


def _vmem_limit_bytes():
    """Generation-aware scoped-VMEM limit (v5e/v6e: 128 MiB phys, v7x: 64 MiB)."""
    cap = 64 * _MiB  # conservative fallback (safe on every generation)
    try:
        cap = int(getattr(pltpu.get_tpu_info(), "vmem_capacity_bytes", cap)) or cap
    except Exception:
        pass
    return min((cap * 3) // 4, 100 * _MiB)


def _choose_pack(n_rows, features, max_fp=512):
    """Lane-packing factor k: view (N, F) as (N//k, k*F) so the lane dim is a
    multiple of 128 (unmasked vld/vst) and as wide as possible (<= max_fp),
    subject to N % k == 0 and at least 8 packed rows remaining."""
    if features % 128 == 0:
        return 1
    k_base = 128 // math.gcd(128, features)
    fp_base = k_base * features              # == lcm(128, features)
    if fp_base > max_fp:
        return 1
    best, m = 1, 1
    while m * fp_base <= max_fp:
        k = m * k_base
        if n_rows % k == 0 and n_rows // k >= 8:
            best = k
        m += 1
    return best


# --------------------------------------------------------------------------
# Kernels
# --------------------------------------------------------------------------
def _fused_kernel(x_ref, o_ref, *, n_rows, epsilon):
    """Whole array resident in VMEM: centred mean/var + normalise in one pass."""
    x = x_ref[...].astype(jnp.float32)
    inv_n = 1.0 / float(n_rows)
    m = jnp.sum(x, axis=0, keepdims=True) * inv_n
    xc = x - m
    v = jnp.sum(xc * xc, axis=0, keepdims=True) * inv_n
    o_ref[...] = (xc * jax.lax.rsqrt(v + epsilon)).astype(o_ref.dtype)


def _fused_packed_kernel(x_ref, g_ref, o_ref, *, n_total, epsilon):
    """Lane-packed fused path: x is (rows, k*F).  g is the (fp, fp) 0/1 matrix
    g[i, j] = (i % F == j % F), so `vec @ g` folds the k lane groups of each
    feature AND spreads the folded value back to every group in one tiny MXU
    matmul (keeps all loads/stores and elementwise math lane-dense)."""
    x = x_ref[...].astype(jnp.float32)
    g = g_ref[...]
    inv_n = 1.0 / float(n_total)
    s = jnp.sum(x, axis=0, keepdims=True)                               # (1, fp)
    m = jnp.dot(s, g, preferred_element_type=jnp.float32) * inv_n       # per-feature mean, spread
    xc = x - m
    q = jnp.sum(xc * xc, axis=0, keepdims=True)                         # centred SS per column
    v = jnp.dot(q, g, preferred_element_type=jnp.float32) * inv_n       # per-feature var, spread
    o_ref[...] = (xc * jax.lax.rsqrt(v + epsilon)).astype(o_ref.dtype)


def _partial_stats_kernel(x_ref, ps_ref, *, tile_rows, rem, needs_mask):
    """Pass 1: per-tile CENTRED partials [sum, sum((x - tile_mean)^2)] per
    packed lane column.  Only the last (remainder) tile pays the mask cost."""

    def full_tile():
        x = x_ref[...].astype(jnp.float32)
        s = jnp.sum(x, axis=0, keepdims=True)
        xc = x - s * (1.0 / float(tile_rows))
        ps_ref[0:1, :] = s
        ps_ref[1:2, :] = jnp.sum(xc * xc, axis=0, keepdims=True)

    if not needs_mask:
        full_tile()
        return

    t = pl.program_id(0)
    last = pl.num_programs(0) - 1

    @pl.when(t < last)           # full tiles: no iota/compare/select cost
    def _():
        full_tile()

    @pl.when(t == last)          # remainder tile only
    def _():
        x = x_ref[...].astype(jnp.float32)
        valid = jax.lax.broadcasted_iota(jnp.int32, x.shape, 0) < rem
        x = jnp.where(valid, x, 0.0)
        s = jnp.sum(x, axis=0, keepdims=True)
        xc = jnp.where(valid, x - s * (1.0 / float(rem)), 0.0)
        ps_ref[0:1, :] = s
        ps_ref[1:2, :] = jnp.sum(xc * xc, axis=0, keepdims=True)


def _normalise_kernel(x_ref, stats_ref, o_ref):
    """Pass 2: elementwise (x - mean) * rstd on each row tile.  For the ragged
    last tile, padded garbage rows flow through the arithmetic but their
    out-of-bounds stores are dropped by Pallas (no traps on TPU)."""
    x = x_ref[...].astype(jnp.float32)
    o_ref[...] = ((x - stats_ref[0:1, :]) * stats_ref[1:2, :]).astype(o_ref.dtype)


# --------------------------------------------------------------------------
# Wrapper
# --------------------------------------------------------------------------
def studentise(x, epsilon=1e-4, *, _force_tiled=False, _max_tile_rows=None):
    """Pallas implementation of taiyaki Studentise.forward."""
    features = x.shape[-1]
    orig_shape = x.shape
    xf = x.reshape(-1, features)          # row-major flatten == torch .view(-1, F)
    n_rows = xf.shape[0]
    dsize = jnp.dtype(x.dtype).itemsize
    work_size = max(dsize, 4)             # in-kernel f32 working copies dominate
    epsilon = float(epsilon)

    vmem_limit = _vmem_limit_bytes()
    fused_budget = min(vmem_limit // 7, 12 * _MiB)   # f32 footprint threshold
    tile_budget = min(vmem_limit // 6, 12 * _MiB)    # streamed per-tile budget (f32)

    # Lane packing: view (N, F) as (N/k, k*F) so loads/stores are lane-dense.
    # The reshape is metadata-only (contiguous row-major).
    k = _choose_pack(n_rows, features)
    rows = n_rows // k
    fp = features * k
    xp = xf.reshape(rows, fp)

    # ---------------- Path A: fused single pass (small/medium inputs) --------
    if (not _force_tiled) and 4 * n_rows * features <= fused_budget:
        if k == 1:
            out = pl.pallas_call(
                functools.partial(_fused_kernel, n_rows=n_rows, epsilon=epsilon),
                out_shape=jax.ShapeDtypeStruct((rows, fp), x.dtype),
                grid=(1,),
                in_specs=[pl.BlockSpec((rows, fp), lambda i: (0, 0))],
                out_specs=pl.BlockSpec((rows, fp), lambda i: (0, 0)),
                compiler_params=pltpu.CompilerParams(vmem_limit_bytes=vmem_limit),
                cost_estimate=pl.CostEstimate(
                    flops=6 * rows * fp,
                    transcendentals=fp,
                    bytes_accessed=2 * rows * fp * dsize),
            )(xp)
        else:
            cols = jnp.arange(fp, dtype=jnp.int32)
            g = (cols[:, None] % features == cols[None, :] % features).astype(jnp.float32)
            out = pl.pallas_call(
                functools.partial(_fused_packed_kernel, n_total=n_rows, epsilon=epsilon),
                out_shape=jax.ShapeDtypeStruct((rows, fp), x.dtype),
                grid=(1,),
                in_specs=[pl.BlockSpec((rows, fp), lambda i: (0, 0)),
                          pl.BlockSpec((fp, fp), lambda i: (0, 0))],
                out_specs=pl.BlockSpec((rows, fp), lambda i: (0, 0)),
                compiler_params=pltpu.CompilerParams(vmem_limit_bytes=vmem_limit),
                cost_estimate=pl.CostEstimate(
                    flops=6 * rows * fp + 4 * fp * fp,
                    transcendentals=fp,
                    bytes_accessed=2 * rows * fp * dsize + fp * fp * 4),
            )(xp, g)
        return out.reshape(orig_shape)

    # ---------------- Path B: two streaming passes (large inputs) -------------
    align = max(8, 32 // dsize)                      # 8 f32, 16 bf16, 32 int8
    tile_rows = max(align, tile_budget // (fp * work_size))
    if _max_tile_rows is not None:
        tile_rows = min(tile_rows, int(_max_tile_rows))
    tile_rows = max(align, (tile_rows // align) * align)
    tile_rows = min(tile_rows, _round_up(rows, align))
    n_tiles = pl.cdiv(rows, tile_rows)
    # Megacore (v7x: 2 TCs): make sure the "parallel" grid axis has >= 2 steps.
    if n_tiles < 2 and rows > align:
        tile_rows = _round_up(-(-rows // 2), align)
        n_tiles = pl.cdiv(rows, tile_rows)
    rem = rows - (n_tiles - 1) * tile_rows
    needs_mask = rem != tile_rows

    # Pass 1: per-tile centred partial stats (parallel grid, no carried state).
    partial = pl.pallas_call(
        functools.partial(_partial_stats_kernel, tile_rows=tile_rows,
                          rem=rem, needs_mask=needs_mask),
        out_shape=jax.ShapeDtypeStruct((n_tiles, 2, fp), jnp.float32),
        grid_spec=pltpu.PrefetchScalarGridSpec(
            num_scalar_prefetch=0,
            grid=(n_tiles,),
            in_specs=[pl.BlockSpec((tile_rows, fp), lambda t: (t, 0))],
            out_specs=pl.BlockSpec((None, 2, fp), lambda t: (t, 0, 0)),
        ),
        compiler_params=pltpu.CompilerParams(
            dimension_semantics=("parallel",),
            vmem_limit_bytes=vmem_limit),
        cost_estimate=pl.CostEstimate(
            flops=5 * rows * fp,
            transcendentals=0,
            bytes_accessed=rows * fp * dsize + n_tiles * 2 * fp * 4),
    )(xp)

    # Tiny JAX epilogue: combine centred per-tile partials with the
    # group-variance decomposition (no E[x^2]-E[x]^2 cancellation), fold the
    # k lane groups, compute mean/rsqrt, and spread back to packed columns.
    s_t = partial[:, 0, :].reshape(n_tiles, k, features)
    m2_t = partial[:, 1, :].reshape(n_tiles, k, features)
    if needs_mask:
        counts = jnp.concatenate(
            [jnp.full((n_tiles - 1,), float(tile_rows), jnp.float32),
             jnp.full((1,), float(rem), jnp.float32)])
    else:
        counts = jnp.full((n_tiles,), float(tile_rows), jnp.float32)
    cnt = counts[:, None, None]                                   # (n_tiles,1,1)
    inv_n = 1.0 / float(n_rows)
    mean = s_t.sum(axis=(0, 1)) * inv_n                           # (F,)
    dev = s_t / cnt - mean
    var = (m2_t.sum(axis=(0, 1)) + (cnt * dev * dev).sum(axis=(0, 1))) * inv_n
    rstd = jax.lax.rsqrt(jnp.maximum(var, 0.0) + epsilon)
    stats = jnp.stack([jnp.tile(mean, k), jnp.tile(rstd, k)]).astype(jnp.float32)

    # Pass 2: elementwise normalisation, lane-dense row tiles.
    out = pl.pallas_call(
        _normalise_kernel,
        out_shape=jax.ShapeDtypeStruct((rows, fp), x.dtype),
        grid_spec=pltpu.PrefetchScalarGridSpec(
            num_scalar_prefetch=0,
            grid=(n_tiles,),
            in_specs=[pl.BlockSpec((tile_rows, fp), lambda t: (t, 0)),
                      pl.BlockSpec((2, fp), lambda t: (0, 0))],
            out_specs=pl.BlockSpec((tile_rows, fp), lambda t: (t, 0)),
        ),
        compiler_params=pltpu.CompilerParams(
            dimension_semantics=("parallel",),
            vmem_limit_bytes=vmem_limit),
        cost_estimate=pl.CostEstimate(
            flops=2 * rows * fp,
            transcendentals=0,
            bytes_accessed=2 * rows * fp * dsize + 2 * fp * 4),
    )(xp, stats)

    return out.reshape(orig_shape)


# --------------------------------------------------------------------------
# Self-test
# --------------------------------------------------------------------------
if __name__ == "__main__":
    key = jax.random.PRNGKey(0)
    k1, k2, k3, k4 = jax.random.split(key, 4)

    def reference(x, eps=1e-4):
        f = x.shape[-1]
        xf = x.reshape(-1, f)
        m = xf.mean(axis=0)
        v = ((xf - m) ** 2).mean(axis=0)          # unbiased=False
        return (x - m) / jnp.sqrt(v + eps)

    # 1) Tiny taiyaki-style input (T=8, B=2, F=32) -> plain fused path (k=1).
    x1 = jax.random.normal(k1, (8, 2, 32), dtype=jnp.float32) * 3.0 + 1.5
    y1 = jax.block_until_ready(studentise(x1, epsilon=1e-4))
    assert y1.shape == x1.shape and y1.dtype == x1.dtype
    assert jnp.allclose(y1, reference(x1), atol=1e-4, rtol=1e-4), "fused path mismatch"

    # 2) Small input with enough rows for lane packing -> fused packed path
    #    (F=32 packs to fp=512 via the matmul fold).
    x2 = jax.random.normal(k2, (64, 2, 32), dtype=jnp.float32) * 2.0 + 0.5
    y2 = jax.block_until_ready(studentise(x2, epsilon=1e-4))
    assert y2.shape == x2.shape and y2.dtype == x2.dtype
    assert jnp.allclose(y2, reference(x2), atol=1e-4, rtol=1e-4), "fused packed mismatch"

    # 3) Forced tiled path with small tiles: F=32 -> k=4 (fp=128), rows=25,
    #    tile=8 -> grid of 4 with a masked remainder tile (pl.when branch).
    x3 = jax.random.normal(k3, (25, 4, 32), dtype=jnp.float32) * 2.0 - 0.7
    y3 = jax.block_until_ready(
        studentise(x3, epsilon=1e-4, _force_tiled=True, _max_tile_rows=8))
    assert y3.shape == x3.shape and y3.dtype == x3.dtype
    assert jnp.allclose(y3, reference(x3), atol=1e-4, rtol=1e-4), "tiled masked mismatch"

    # 4) Forced tiled path with default (large) tile budget: exercises the
    #    n_tiles>=2 megacore split and the unmasked-tile code path.
    x4 = jax.random.normal(k4, (32, 4, 64), dtype=jnp.float32) * 1.3 + 2.0
    y4 = jax.block_until_ready(studentise(x4, epsilon=1e-4, _force_tiled=True))
    assert y4.shape == x4.shape and y4.dtype == x4.dtype
    assert jnp.allclose(y4, reference(x4), atol=1e-4, rtol=1e-4), "tiled even mismatch"

    print("KERNEL_OK")
</pallas_src>

<mosaic_0001>
module attributes {stable_mosaic.version = 11 : i64} {
  func.func @_fused_kernel(%arg0: i32, %arg1: memref<16x32xf32, #tpu.memory_space<vmem>>, %arg2: memref<16x32xf32, #tpu.memory_space<vmem>>) attributes {dimension_semantics = [#tpu.dimension_semantics<arbitrary>], iteration_bounds = array<i64: 1>, scalar_prefetch = 0 : i64, scratch_operands = 0 : i64, tpu.core_type = #tpu.core_type<tc>, window_params = [{pipeline_mode = #tpu.pipeline_mode<synchronous>, transform_indices = @transform_0, window_bounds = array<i64: 16, 32>}, {pipeline_mode = #tpu.pipeline_mode<synchronous>, transform_indices = @transform_1, window_bounds = array<i64: 16, 32>}]} {
    %c0 = arith.constant 0 : index
    %c0_0 = arith.constant 0 : index
    %0 = vector.load %arg1[%c0, %c0_0] : memref<16x32xf32, #tpu.memory_space<vmem>>, vector<16x32xf32>
    %cst = arith.constant dense<0.000000e+00> : vector<32xf32>
    %1 = vector.multi_reduction <add>, %0, %cst [0] : vector<16x32xf32> to vector<32xf32>
    %2 = vector.shape_cast %1 : vector<32xf32> to vector<1x32xf32>
    %cst_1 = arith.constant 6.250000e-02 : f32
    %3 = vector.broadcast %cst_1 : f32 to vector<1x32xf32>
    %4 = arith.mulf %2, %3 : vector<1x32xf32>
    %5 = vector.broadcast %4 : vector<1x32xf32> to vector<16x32xf32>
    %6 = arith.subf %0, %5 : vector<16x32xf32>
    %7 = arith.mulf %6, %6 : vector<16x32xf32>
    %cst_2 = arith.constant dense<0.000000e+00> : vector<32xf32>
    %8 = vector.multi_reduction <add>, %7, %cst_2 [0] : vector<16x32xf32> to vector<32xf32>
    %9 = vector.shape_cast %8 : vector<32xf32> to vector<1x32xf32>
    %cst_3 = arith.constant 6.250000e-02 : f32
    %10 = vector.broadcast %cst_3 : f32 to vector<1x32xf32>
    %11 = arith.mulf %9, %10 : vector<1x32xf32>
    %cst_4 = arith.constant 9.99999974E-5 : f32
    %12 = vector.broadcast %cst_4 : f32 to vector<1x32xf32>
    %13 = arith.addf %11, %12 : vector<1x32xf32>
    %14 = math.rsqrt %13 : vector<1x32xf32>
    %15 = vector.broadcast %14 : vector<1x32xf32> to vector<16x32xf32>
    %16 = arith.mulf %6, %15 : vector<16x32xf32>
    %c0_5 = arith.constant 0 : index
    %c0_6 = arith.constant 0 : index
    %17 = vector.load %arg2[%c0_5, %c0_6] : memref<16x32xf32, #tpu.memory_space<vmem>>, vector<16x32xf32>
    tpu.vector_store %arg2[%c0_5, %c0_6], %16 {strides = array<i32>} : memref<16x32xf32, #tpu.memory_space<vmem>>, vector<16x32xf32>,
    return
  }
  func.func @transform_0(%arg0: i32) -> (i32, i32) {
    %c0_i32 = arith.constant 0 : i32
    %c0_i32_0 = arith.constant 0 : i32
    %c0_i32_1 = arith.constant 0 : i32
    return %c0_i32, %c0_i32_0 : i32, i32
  }
  func.func @transform_1(%arg0: i32) -> (i32, i32) {
    %c0_i32 = arith.constant 0 : i32
    %c0_i32_0 = arith.constant 0 : i32
    %c0_i32_1 = arith.constant 0 : i32
    return %c0_i32, %c0_i32_0 : i32, i32
  }
}

</mosaic_0001>

<bundles_post_ra>
// kernel: tpu_custom_call.1
= control target key start
LH: loop header
LB: loop body
LE: loop exit
PB: predicated region body
PF: predicated region fallthrough
CT: control target
= control target key end

     0   :  { %6 = vsyncpa [#allocation3], 0  ;;  %s176_s0 = inlined_call_operand.hbm [shape: f32[16,32], index: 0, kind: input, shape index: {}]   ;;  %s177_s1 = inlined_call_operand.hbm [shape: f32[16,32], index: 1, kind: output, shape index: {}]  }
   0x1   :  { %7 = vsyncpa [#allocation4], 0  ;;  %s12_s8 = sshll.u32 %s176_s0, 4  ;;  %s144_s9 = smov [#allocation2]   ;;  %s13_s8 = int_to_ptr.hbm [resolvable:$true] %s12_s8 }
   0x2   :  { %s14_s10 = sshll.u32 %s144_s9, 4  ;;  %s145_s11 = smov 128   ;;  %s15_s10 = int_to_ptr.vmem [resolvable:$true] %s14_s10 }
   0x3   :  { %s146_s12 = smov 8  }
   0x4   :  { %20 = dma.hbm_to_vmem [thread:$0]  %s13_s8, 256, %s15_s10, [#allocation3], %s145_s11, %s145_s11, %s146_s12  }
   0x5   :  { %140 = dma.done.wait [#allocation3], 256  }
   0x6   :  { %141 = vsyncadd [#allocation3], 4294967040  ;;  %vm27_vm0 = vcmask 261120   ;;  %v25_v0 = vld [vmem:[#allocation2] sm:$0xff]  ;;  %v26_v1 = vld [vmem:[#allocation2 + $0x8] sm:$0xff]  ;;  %s147_s0 = smov [#allocation5]  }
   0x7   :  { %v28_v2 = vsel %vm27_vm0, %v25_v0, 0.0  ;;  %v29_v3 = vsel %vm27_vm0, %v26_v1, 0.0  ;;  %s71_s13 = sshll.u32 %s147_s0, 4  ;;  %s73_s16 = sshll.u32 %s177_s1, 4  ;;  %s72_s13 = int_to_ptr.vmem [resolvable:$true] %s71_s13  ;;  %s74_s16 = int_to_ptr.hbm [resolvable:$true] %s73_s16 }
   0x8   :  { %v30_v4 = vadd.f32 %v29_v3, %v28_v2 }
   0xa   :  { %v31_v5 = vrot.slane %v30_v4, 4 }
   0xc   :  { %v32_v6 = vadd.f32 %v31_v5, %v30_v4 }
   0xe   :  { %v33_v7 = vrot.slane %v32_v6, 2 }
  0x10   :  { %v34_v8 = vadd.f32 %v33_v7, %v32_v6 }
  0x12   :  { %v35_v9 = vrot.slane %v34_v8, 1 }
  0x14   :  { %v36_v10 = vadd.f32 %v35_v9, %v34_v8 }
  0x16   :  { %v37_v11 = vmul.f32 0.0625, %v36_v10 }
  0x18   :  { %v38_v12 = vsub.f32 %v25_v0, %v37_v11  ;;  %v39_v13 = vsub.f32 %v26_v1, %v37_v11 }
  0x1a   :  { %v40_v14 = vmul.f32 %v38_v12, %v38_v12  ;;  %v41_v15 = vmul.f32 %v39_v13, %v39_v13 }
  0x1c   :  { %v42_v16 = vsel %vm27_vm0, %v40_v14, 0.0  ;;  %v43_v17 = vsel %vm27_vm0, %v41_v15, 0.0 }
  0x1d   :  { %v44_v18 = vadd.f32 %v43_v17, %v42_v16 }
  0x1f   :  { %v45_v19 = vrot.slane %v44_v18, 4 }
  0x21   :  { %v46_v20 = vadd.f32 %v45_v19, %v44_v18 }
  0x23   :  { %v47_v21 = vrot.slane %v46_v20, 2 }
  0x25   :  { %v48_v22 = vadd.f32 %v47_v21, %v46_v20 }
  0x27   :  { %v49_v23 = vrot.slane %v48_v22, 1 }
  0x29   :  { %v50_v24 = vadd.f32 %v49_v23, %v48_v22 }
  0x2b   :  { %v51_v25 = vmul.f32 0.0625, %v50_v24 }
  0x2d   :  { %v52_v26 = vadd.f32 0.0001, %v51_v25 }
  0x2f   :  { %90 = vrsqrt.f32 %v52_v26  ;;  %vm59_vm1 = vweird.f32 %v52_v26 }
  0x35   :  { %v91_v27 = vpop.eup %90 }
  0x36   :  { %v54_v28 = vmul.f32 %v91_v27, %v52_v26  ;;  %vm60_vm2 = vweird.f32 %v91_v27 }
  0x37   :  { %vm61_vm3 = vmor %vm59_vm1, %vm60_vm2 }
  0x38   :  { %v55_v29 = vmul.f32 %v91_v27, %v54_v28 }
  0x3a   :  { %v56_v30 = vmul.f32 0.5, %v55_v29 }
  0x3c   :  { %v57_v31 = vsub.f32 1.5, %v56_v30 }
  0x3e   :  { %v58_v32 = vmul.f32 %v91_v27, %v57_v31 }
  0x40   :  { %v62_v33 = vsel %vm61_vm3, %v91_v27, %v58_v32 }
  0x41   :  { %v63_v34 = vmul.f32 %v62_v33, %v38_v12  ;;  %v64_v35 = vmul.f32 %v62_v33, %v39_v13 }
  0x43   :  { %65 = vst.msk [vmem:[#allocation5] sm:$0xff] %vm27_vm0, %v63_v34 }
  0x44   :  { %66 = vst.msk [vmem:[#allocation5 + $0x8] sm:$0xff] %vm27_vm0, %v64_v35 }
  0x45   :  { %79 = dma.vmem_to_hbm [thread:$0]  %s72_s13, 256, %s74_s16, [#allocation4], %s145_s11, %s145_s11, %s146_s12  }
  0x46   :  { %142 = dma.done.wait [#allocation4], 256  }
  0x47   :  { %143 = vsyncadd [#allocation4], 4294967040 }
  0x48   :  { %84 = vsyncpa [#allocation3], 1 }
  0x49   :  { %85 = vsyncpa [#allocation4], 1 }

</bundles_post_ra>
